<compile_context>
chip_gen: v5e
topology: v5e:2x2
jax: 0.10.0
libtpu: 0.0.40
codegen_flags: <defaults>
</compile_context>

<pallas_src>
import jax
import jax.numpy as jnp
from jax.experimental import pallas as pl
from jax.experimental.pallas import tpu as pltpu

LANE = 128
SUBLANE = 8


def _round_up(x, m):
    return ((x + m - 1) // m) * m


def _cdiv(a, b):
    return (a + b - 1) // b


def latent_dynamics_kernel(z_ref, w1_ref, b1_ref, w2_ref, b2_ref, w3_ref, b3_ref,
                           sneg_ref, out_ref):
    """3-layer MLP (ReLU, ReLU, Tanh) + fused '- 0.001 * expanded z' via one small matmul."""
    z = z_ref[...]                                                        # (TB, Z)

    h = jnp.dot(z, w1_ref[...], preferred_element_type=jnp.float32) + b1_ref[...]
    h = jnp.maximum(h, 0.0)                                               # ReLU
    h = jnp.dot(h, w2_ref[...], preferred_element_type=jnp.float32) + b2_ref[...]
    h = jnp.maximum(h, 0.0)                                               # ReLU
    y = jnp.dot(h, w3_ref[...], preferred_element_type=jnp.float32) + b3_ref[...]
    y = jnp.tanh(y)                                                       # (TB, Z*X)

    # Sneg[i, i*x_size + j] = -0.001  =>  z @ Sneg == -0.001 * z expanded along x.
    out_ref[...] = y + jnp.dot(z, sneg_ref[...], preferred_element_type=jnp.float32)


def prepare_params(params, z_size, x_size, hidden_size):
    """One-time prep: pad hidden width to a lane multiple (exact zero padding) and
    build the -0.001 selection matrix for the fused epilogue."""
    w1, b1, w2, b2, w3, b3 = params
    h_pad = _round_up(hidden_size, LANE)
    n_out = z_size * x_size                                   # output kept unpadded

    def pad(a, rows, cols):
        return jnp.pad(a, ((0, rows - a.shape[0]), (0, cols - a.shape[1])))

    rows_idx = jnp.repeat(jnp.arange(z_size), x_size)          # (n_out,)
    sneg = (-0.001 * jax.nn.one_hot(rows_idx, z_size, dtype=jnp.float32)).T  # (Z, n_out)

    return (pad(w1, z_size, h_pad), pad(b1, 1, h_pad),
            pad(w2, h_pad, h_pad), pad(b2, 1, h_pad),
            pad(w3, h_pad, n_out), pad(b3, 1, n_out),
            sneg)


def latent_dynamics_forward(t, z, prepared, z_size, x_size, *,
                            block_batch=2048, force_pallas=False,
                            small_fallback_rows=64):
    """Wrapper: adaptive batch tiling, resident weights, single Pallas call."""
    del t  # ODE time argument is unused by the module; kept for signature parity
    w1, b1, w2, b2, w3, b3, sneg = prepared
    n_out = z_size * x_size

    lead_shape = z.shape[:-1]
    z2 = z.reshape(-1, z_size)
    batch = z2.shape[0]

    if (not force_pallas) and batch < small_fallback_rows:
        # Tiny workloads: fused XLA beats kernel dispatch overhead.
        h = jnp.maximum(z2 @ w1 + b1, 0.0)
        h = jnp.maximum(h @ w2 + b2, 0.0)
        y = jnp.tanh(h @ w3 + b3) + z2 @ sneg
        return y.reshape(*lead_shape, z_size, x_size)

    # --- adaptive tile selection -------------------------------------------------
    # * amortize per-step overhead (large tiles),
    # * keep >=2 grid steps when possible so v7x's second TensorCore gets work,
    # * size the tile so padded_batch barely exceeds batch (no ~2x padding waste),
    # * force tile to a multiple of 8 (legal second-to-last block dim).
    block_batch = max(SUBLANE, _round_up(int(block_batch), SUBLANE))
    rows = _round_up(batch, SUBLANE)
    steps = _cdiv(rows, block_batch)
    if steps < 2 and rows >= 2 * SUBLANE:
        steps = 2
    tb = min(block_batch, _round_up(_cdiv(rows, steps), SUBLANE))
    padded_batch = _round_up(batch, tb)
    if padded_batch != batch:
        z2 = jnp.pad(z2, ((0, padded_batch - batch), (0, 0)))
    grid = (padded_batch // tb,)

    # Constant block index -> weights/biases/Sneg stay resident in VMEM across the grid.
    resident = lambda a: pl.BlockSpec(a.shape, lambda i: (0, 0))

    out_flat = pl.pallas_call(
        latent_dynamics_kernel,
        out_shape=jax.ShapeDtypeStruct((padded_batch, n_out), jnp.float32),
        grid=grid,
        in_specs=[pl.BlockSpec((tb, z_size), lambda i: (i, 0)),
                  resident(w1), resident(b1),
                  resident(w2), resident(b2),
                  resident(w3), resident(b3),
                  resident(sneg)],
        out_specs=pl.BlockSpec((tb, n_out), lambda i: (i, 0)),
        compiler_params=pltpu.CompilerParams(
            dimension_semantics=("parallel",)),      # megacore-shards batch on v7x
    )(z2, w1, b1, w2, b2, w3, b3, sneg)

    if padded_batch != batch:
        out_flat = out_flat[:batch]
    # Trailing reshape of a contiguous (batch, z*x) slab is free (no compaction copy).
    return out_flat.reshape(*lead_shape, z_size, x_size)


def init_params(key, z_size, x_size, hidden_size):
    """Deterministic synthetic parameters (num_layer = 3 linear layers)."""
    ks = jax.random.split(key, 6)
    dims = [(z_size, hidden_size), (hidden_size, hidden_size),
            (hidden_size, z_size * x_size)]
    params = []
    for i, (fan_in, fan_out) in enumerate(dims):
        w = jax.random.normal(ks[2 * i], (fan_in, fan_out), jnp.float32) / jnp.sqrt(fan_in)
        b = jax.random.normal(ks[2 * i + 1], (1, fan_out), jnp.float32) * 0.01
        params += [w, b]
    return tuple(params)


def reference_forward(t, z, params, z_size, x_size):
    """Pure-JAX reference mirroring the PyTorch module, for correctness check."""
    del t
    w1, b1, w2, b2, w3, b3 = params
    h = jnp.maximum(z @ w1 + b1, 0.0)
    h = jnp.maximum(h @ w2 + b2, 0.0)
    y = jnp.tanh(h @ w3 + b3).reshape(*z.shape[:-1], z_size, x_size)
    return y - 0.001 * z[..., None]


if __name__ == "__main__":
    key = jax.random.PRNGKey(0)
    z_size, x_size, hidden_size, batch = 4, 6, 32, 8

    k_param, k_z, k_z_big = jax.random.split(key, 3)
    params = init_params(k_param, z_size, x_size, hidden_size)
    prepared = prepare_params(params, z_size, x_size, hidden_size)

    t = jnp.float32(0.0)

    # Small shape (module-sized) — force the Pallas path so the kernel is exercised.
    z = jax.random.normal(k_z, (batch, z_size), jnp.float32)
    out = latent_dynamics_forward(t, z, prepared, z_size, x_size, force_pallas=True)
    out = jax.block_until_ready(out)
    ref = reference_forward(t, z, params, z_size, x_size)
    assert out.shape == (batch, z_size, x_size)
    assert jnp.allclose(out, ref, atol=1e-5, rtol=1e-5)

    # Multi-tile path: exercises adaptive tiling, >=2 grid steps, and batch padding.
    z_big = jax.random.normal(k_z_big, (300, z_size), jnp.float32)
    out_big = latent_dynamics_forward(t, z_big, prepared, z_size, x_size,
                                      block_batch=128, force_pallas=True)
    out_big = jax.block_until_ready(out_big)
    ref_big = reference_forward(t, z_big, params, z_size, x_size)
    assert out_big.shape == (300, z_size, x_size)
    assert jnp.allclose(out_big, ref_big, atol=1e-5, rtol=1e-5)

    print("KERNEL_OK")
</pallas_src>

<mosaic_0001>
module attributes {stable_mosaic.version = 11 : i64} {
  func.func @latent_dynamics_kernel(%arg0: i32, %arg1: memref<8x4xf32, #tpu.memory_space<vmem>>, %arg2: memref<4x128xf32, #tpu.memory_space<vmem>>, %arg3: memref<1x128xf32, #tpu.memory_space<vmem>>, %arg4: memref<128x128xf32, #tpu.memory_space<vmem>>, %arg5: memref<1x128xf32, #tpu.memory_space<vmem>>, %arg6: memref<128x24xf32, #tpu.memory_space<vmem>>, %arg7: memref<1x24xf32, #tpu.memory_space<vmem>>, %arg8: memref<4x24xf32, #tpu.memory_space<vmem>>, %arg9: memref<8x24xf32, #tpu.memory_space<vmem>>) attributes {dimension_semantics = [#tpu.dimension_semantics<parallel>], iteration_bounds = array<i64: 1>, scalar_prefetch = 0 : i64, scratch_operands = 0 : i64, tpu.core_type = #tpu.core_type<tc>, window_params = [{transform_indices = @transform_0, window_bounds = array<i64: 8, 4>}, {pipeline_mode = #tpu.pipeline_mode<synchronous>, transform_indices = @transform_1, window_bounds = array<i64: 4, 128>}, {pipeline_mode = #tpu.pipeline_mode<synchronous>, transform_indices = @transform_2, window_bounds = array<i64: 1, 128>}, {pipeline_mode = #tpu.pipeline_mode<synchronous>, transform_indices = @transform_3, window_bounds = array<i64: 128, 128>}, {pipeline_mode = #tpu.pipeline_mode<synchronous>, transform_indices = @transform_4, window_bounds = array<i64: 1, 128>}, {pipeline_mode = #tpu.pipeline_mode<synchronous>, transform_indices = @transform_5, window_bounds = array<i64: 128, 24>}, {pipeline_mode = #tpu.pipeline_mode<synchronous>, transform_indices = @transform_6, window_bounds = array<i64: 1, 24>}, {pipeline_mode = #tpu.pipeline_mode<synchronous>, transform_indices = @transform_7, window_bounds = array<i64: 4, 24>}, {transform_indices = @transform_8, window_bounds = array<i64: 8, 24>}]} {
    %c0 = arith.constant 0 : index
    %c0_0 = arith.constant 0 : index
    %0 = vector.load %arg1[%c0, %c0_0] : memref<8x4xf32, #tpu.memory_space<vmem>>, vector<8x4xf32>
    %c0_1 = arith.constant 0 : index
    %c0_2 = arith.constant 0 : index
    %1 = vector.load %arg2[%c0_1, %c0_2] : memref<4x128xf32, #tpu.memory_space<vmem>>, vector<4x128xf32>
    %cst = arith.constant dense<0.000000e+00> : vector<8x128xf32>
    %2 = tpu.matmul %0, %1, %cst {dimension_numbers = #tpu.dot_dimension_numbers<[1], [0], [0], [1], [0, 0, 1, 1], [], []>} : vector<8x4xf32>, vector<4x128xf32>, vector<8x128xf32> -> vector<8x128xf32>
    %c0_3 = arith.constant 0 : index
    %c0_4 = arith.constant 0 : index
    %3 = vector.load %arg3[%c0_3, %c0_4] : memref<1x128xf32, #tpu.memory_space<vmem>>, vector<1x128xf32>
    %4 = vector.broadcast %3 : vector<1x128xf32> to vector<8x128xf32>
    %5 = arith.addf %2, %4 : vector<8x128xf32>
    %cst_5 = arith.constant 0.000000e+00 : f32
    %6 = vector.broadcast %cst_5 : f32 to vector<8x128xf32>
    %7 = arith.maximumf %5, %6 : vector<8x128xf32>
    %c0_6 = arith.constant 0 : index
    %c0_7 = arith.constant 0 : index
    %8 = vector.load %arg4[%c0_6, %c0_7] : memref<128x128xf32, #tpu.memory_space<vmem>>, vector<128x128xf32>
    %cst_8 = arith.constant dense<0.000000e+00> : vector<8x128xf32>
    %9 = tpu.matmul %7, %8, %cst_8 {dimension_numbers = #tpu.dot_dimension_numbers<[1], [0], [0], [1], [0, 0, 1, 1], [], []>} : vector<8x128xf32>, vector<128x128xf32>, vector<8x128xf32> -> vector<8x128xf32>
    %c0_9 = arith.constant 0 : index
    %c0_10 = arith.constant 0 : index
    %10 = vector.load %arg5[%c0_9, %c0_10] : memref<1x128xf32, #tpu.memory_space<vmem>>, vector<1x128xf32>
    %11 = vector.broadcast %10 : vector<1x128xf32> to vector<8x128xf32>
    %12 = arith.addf %9, %11 : vector<8x128xf32>
    %cst_11 = arith.constant 0.000000e+00 : f32
    %13 = vector.broadcast %cst_11 : f32 to vector<8x128xf32>
    %14 = arith.maximumf %12, %13 : vector<8x128xf32>
    %c0_12 = arith.constant 0 : index
    %c0_13 = arith.constant 0 : index
    %15 = vector.load %arg6[%c0_12, %c0_13] : memref<128x24xf32, #tpu.memory_space<vmem>>, vector<128x24xf32>
    %cst_14 = arith.constant dense<0.000000e+00> : vector<8x24xf32>
    %16 = tpu.matmul %14, %15, %cst_14 {dimension_numbers = #tpu.dot_dimension_numbers<[1], [0], [0], [1], [0, 0, 1, 1], [], []>} : vector<8x128xf32>, vector<128x24xf32>, vector<8x24xf32> -> vector<8x24xf32>
    %c0_15 = arith.constant 0 : index
    %c0_16 = arith.constant 0 : index
    %17 = vector.load %arg7[%c0_15, %c0_16] : memref<1x24xf32, #tpu.memory_space<vmem>>, vector<1x24xf32>
    %18 = vector.broadcast %17 : vector<1x24xf32> to vector<8x24xf32>
    %19 = arith.addf %16, %18 : vector<8x24xf32>
    %20 = math.tanh %19 : vector<8x24xf32>
    %c0_17 = arith.constant 0 : index
    %c0_18 = arith.constant 0 : index
    %21 = vector.load %arg8[%c0_17, %c0_18] : memref<4x24xf32, #tpu.memory_space<vmem>>, vector<4x24xf32>
    %cst_19 = arith.constant dense<0.000000e+00> : vector<8x24xf32>
    %22 = tpu.matmul %0, %21, %cst_19 {dimension_numbers = #tpu.dot_dimension_numbers<[1], [0], [0], [1], [0, 0, 1, 1], [], []>} : vector<8x4xf32>, vector<4x24xf32>, vector<8x24xf32> -> vector<8x24xf32>
    %23 = arith.addf %20, %22 : vector<8x24xf32>
    %c0_20 = arith.constant 0 : index
    %c0_21 = arith.constant 0 : index
    %24 = vector.load %arg9[%c0_20, %c0_21] : memref<8x24xf32, #tpu.memory_space<vmem>>, vector<8x24xf32>
    tpu.vector_store %arg9[%c0_20, %c0_21], %23 {strides = array<i32>} : memref<8x24xf32, #tpu.memory_space<vmem>>, vector<8x24xf32>,
    return
  }
  func.func @transform_0(%arg0: i32) -> (i32, i32) {
    %c0_i32 = arith.constant 0 : i32
    %c0_i32_0 = arith.constant 0 : i32
    return %arg0, %c0_i32 : i32, i32
  }
  func.func @transform_1(%arg0: i32) -> (i32, i32) {
    %c0_i32 = arith.constant 0 : i32
    %c0_i32_0 = arith.constant 0 : i32
    %c0_i32_1 = arith.constant 0 : i32
    return %c0_i32, %c0_i32_0 : i32, i32
  }
  func.func @transform_2(%arg0: i32) -> (i32, i32) {
    %c0_i32 = arith.constant 0 : i32
    %c0_i32_0 = arith.constant 0 : i32
    %c0_i32_1 = arith.constant 0 : i32
    return %c0_i32, %c0_i32_0 : i32, i32
  }
  func.func @transform_3(%arg0: i32) -> (i32, i32) {
    %c0_i32 = arith.constant 0 : i32
    %c0_i32_0 = arith.constant 0 : i32
    %c0_i32_1 = arith.constant 0 : i32
    return %c0_i32, %c0_i32_0 : i32, i32
  }
  func.func @transform_4(%arg0: i32) -> (i32, i32) {
    %c0_i32 = arith.constant 0 : i32
    %c0_i32_0 = arith.constant 0 : i32
    %c0_i32_1 = arith.constant 0 : i32
    return %c0_i32, %c0_i32_0 : i32, i32
  }
  func.func @transform_5(%arg0: i32) -> (i32, i32) {
    %c0_i32 = arith.constant 0 : i32
    %c0_i32_0 = arith.constant 0 : i32
    %c0_i32_1 = arith.constant 0 : i32
    return %c0_i32, %c0_i32_0 : i32, i32
  }
  func.func @transform_6(%arg0: i32) -> (i32, i32) {
    %c0_i32 = arith.constant 0 : i32
    %c0_i32_0 = arith.constant 0 : i32
    %c0_i32_1 = arith.constant 0 : i32
    return %c0_i32, %c0_i32_0 : i32, i32
  }
  func.func @transform_7(%arg0: i32) -> (i32, i32) {
    %c0_i32 = arith.constant 0 : i32
    %c0_i32_0 = arith.constant 0 : i32
    %c0_i32_1 = arith.constant 0 : i32
    return %c0_i32, %c0_i32_0 : i32, i32
  }
  func.func @transform_8(%arg0: i32) -> (i32, i32) {
    %c0_i32 = arith.constant 0 : i32
    %c0_i32_0 = arith.constant 0 : i32
    return %arg0, %c0_i32 : i32, i32
  }
}

</mosaic_0001>

<bundles_post_ra>
// kernel: tpu_custom_call.1
= control target key start
LH: loop header
LB: loop body
LE: loop exit
PB: predicated region body
PF: predicated region fallthrough
CT: control target
= control target key end

     0   :  { %vm40_vm0 = vcmask 1043456   ;;  %vm36_vm1 = vcmask 31744   ;;  %s397_s0 = inlined_call_operand.vmem [shape: f32[8,4], index: 0, kind: input, shape index: {}]   ;;  %s398_s1 = inlined_call_operand.vmem [shape: f32[4,128], index: 1, kind: input, shape index: {}]   ;;  %s399_s2 = inlined_call_operand.vmem [shape: f32[1,128], index: 2, kind: input, shape index: {}]   ;;  %s400_s3 = inlined_call_operand.vmem [shape: f32[128,128], index: 3, kind: input, shape index: {}]   ;;  %s401_s4 = inlined_call_operand.vmem [shape: f32[1,128], index: 4, kind: input, shape index: {}]   ;;  %s402_s5 = inlined_call_operand.vmem [shape: f32[128,24], index: 5, kind: input, shape index: {}]   ;;  %s403_s6 = inlined_call_operand.vmem [shape: f32[1,24], index: 6, kind: input, shape index: {}]   ;;  %s404_s7 = inlined_call_operand.vmem [shape: f32[4,24], index: 7, kind: input, shape index: {}]   ;;  %s405_s8 = inlined_call_operand.hbm [shape: f32[8,24], index: 8, kind: output, shape index: {}]  }
   0x1   :  { %v31_v0 = vld [vmem:[%s398_s1] sm:$0xf]  ;;  %v80_v2 = vld [vmem:[%s400_s3 + $0x78] sm:$0xff]  ;;  %v79_v3 = vld [vmem:[%s400_s3 + $0x70] sm:$0xff] }
   0x2   :  { %v278_v1 = vld [vmem:[%s397_s0] sm:$0xff]  ;;  %190 = vmatpush.msk.msra.mxu0 %vm40_vm0, %v31_v0  ;;  %85 = vmatpush.msra.mxu1 %v80_v2  ;;  %v78_v4 = vld [vmem:[%s400_s3 + $0x68] sm:$0xff]  ;;  %v76_v6 = vld [vmem:[%s400_s3 + $0x58] sm:$0xff] }
   0x3   :  { %191 = vmatmul.msk.f32.vlgmr.msra.gmra.mxu0 %vm36_vm1, %v278_v1  ;;  %v77_v5 = vld [vmem:[%s400_s3 + $0x60] sm:$0xff] }
   0x4   :  { %86 = vmatpush.msra.mxu1 %v79_v3 }
   0x6   :  { %87 = vmatpush.msra.mxu1 %v78_v4 }
   0x7   :  { %13 = vsyncpa [#allocation3], 0  ;;  %v75_v7 = vld [vmem:[%s400_s3 + $0x50] sm:$0xff]  ;;  %v74_v8 = vld [vmem:[%s400_s3 + $0x48] sm:$0xff]  ;;  %s181_s30 = sshll.u32 %s405_s8, 4  ;;  %vm172_vm2 = vcmask 195584   ;;  %s182_s30 = int_to_ptr.hbm [resolvable:$true] %s181_s30 }
   0x8   :  { %88 = vmatpush.msra.mxu1 %v77_v5  ;;  %v73_v9 = vld [vmem:[%s400_s3 + $0x40] sm:$0xff]  ;;  %v72_v10 = vld [vmem:[%s400_s3 + $0x38] sm:$0xff]  ;;  %v71_v11 = vld [vmem:[%s400_s3 + $0x30] sm:$0xff] }
   0x9   :  { %v70_v12 = vld [vmem:[%s400_s3 + $0x28] sm:$0xff]  ;;  %v69_v13 = vld [vmem:[%s400_s3 + $0x20] sm:$0xff]  ;;  %v68_v14 = vld [vmem:[%s400_s3 + $0x18] sm:$0xff] }
   0xa   :  { %89 = vmatpush.msra.mxu1 %v76_v6  ;;  %v67_v15 = vld [vmem:[%s400_s3 + $0x10] sm:$0xff]  ;;  %v66_v16 = vld [vmem:[%s400_s3 + $0x8] sm:$0xff]  ;;  %v65_v17 = vld [vmem:[%s400_s3] sm:$0xff] }
   0xb   :  { %v121_v18 = vld [vmem:[%s402_s5 + $0x78] sm:$0xff]  ;;  %v120_v19 = vld [vmem:[%s402_s5 + $0x70] sm:$0xff]  ;;  %v119_v20 = vld [vmem:[%s402_s5 + $0x68] sm:$0xff] }
   0xc   :  { %90 = vmatpush.msra.mxu1 %v75_v7  ;;  %126 = vmatpush.msra.mxu2 %v121_v18  ;;  %v118_v21 = vld [vmem:[%s402_s5 + $0x60] sm:$0xff]  ;;  %v117_v22 = vld [vmem:[%s402_s5 + $0x58] sm:$0xff]  ;;  %v116_v23 = vld [vmem:[%s402_s5 + $0x50] sm:$0xff] }
   0xd   :  { %v115_v24 = vld [vmem:[%s402_s5 + $0x48] sm:$0xff]  ;;  %v114_v25 = vld [vmem:[%s402_s5 + $0x40] sm:$0xff]  ;;  %v113_v26 = vld [vmem:[%s402_s5 + $0x38] sm:$0xff] }
   0xe   :  { %91 = vmatpush.msra.mxu1 %v74_v8  ;;  %127 = vmatpush.msra.mxu2 %v120_v19  ;;  %v112_v27 = vld [vmem:[%s402_s5 + $0x30] sm:$0xff]  ;;  %v111_v28 = vld [vmem:[%s402_s5 + $0x28] sm:$0xff]  ;;  %v110_v29 = vld [vmem:[%s402_s5 + $0x20] sm:$0xff] }
   0xf   :  { %v109_v30 = vld [vmem:[%s402_s5 + $0x18] sm:$0xff]  ;;  %v195_v31 = vld [vmem:[%s399_s2] ss:$0 sm:$0xff]  ;;  %v108_v35 = vld [vmem:[%s402_s5 + $0x10] sm:$0xff] }
  0x10   :  { %92 = vmatpush.msra.mxu1 %v73_v9  ;;  %128 = vmatpush.msra.mxu2 %v119_v20  ;;  %v107_v36 = vld [vmem:[%s402_s5 + $0x8] sm:$0xff]  ;;  %v106_v37 = vld [vmem:[%s402_s5] sm:$0xff] }
  0x11   :  { %v147_v38 = vld [vmem:[%s404_s7] sm:$0xf]  ;;  %s226_s7 = smov [#allocation2]  }
  0x12   :  { %93 = vmatpush.msra.mxu1 %v72_v10  ;;  %129 = vmatpush.msra.mxu2 %v118_v21  ;;  %v196_v39 = vld [vmem:[%s401_s4] ss:$0 sm:$0xff]  ;;  %s179_s27 = sshll.u32 %s226_s7, 4  ;;  %s180_s27 = int_to_ptr.vmem [resolvable:$true] %s179_s27 }
  0x13   :  { %192 = vmatpush.msk.msra.mxu3 %vm40_vm0, %v147_v38  ;;  %v197_v43 = vld [vmem:[%s403_s6] ss:$0 sm:$0xff] }
  0x14   :  { %94 = vmatpush.msra.mxu1 %v71_v11  ;;  %130 = vmatpush.msra.mxu2 %v117_v22 }
  0x15   :  { %193 = vmatmul.msk.f32.vlgmr.msra.gmra.mxu3 %vm36_vm1, %v278_v1 }
  0x16   :  { %95 = vmatpush.msra.mxu1 %v70_v12  ;;  %131 = vmatpush.msra.mxu2 %v116_v23 }
  0x18   :  { %96 = vmatpush.msra.mxu1 %v69_v13  ;;  %132 = vmatpush.msra.mxu2 %v115_v24 }
  0x1a   :  { %97 = vmatpush.msra.mxu1 %v68_v14  ;;  %133 = vmatpush.msra.mxu2 %v114_v25 }
  0x1c   :  { %98 = vmatpush.msra.mxu1 %v67_v15  ;;  %134 = vmatpush.msra.mxu2 %v113_v26 }
  0x1e   :  { %99 = vmatpush.msra.mxu1 %v66_v16  ;;  %135 = vmatpush.msra.mxu2 %v112_v27 }
  0x20   :  { %100 = vmatpush.msra.mxu1 %v65_v17  ;;  %136 = vmatpush.msra.mxu2 %v111_v28 }
  0x22   :  { %137 = vmatpush.msra.mxu2 %v110_v29 }
  0x24   :  { %138 = vmatpush.msra.mxu2 %v109_v30 }
  0x26   :  { %139 = vmatpush.msra.mxu2 %v108_v35 }
  0x28   :  { %140 = vmatpush.msra.mxu2 %v107_v36 }
  0x2a   :  { %141 = vmatpush.msra.mxu2 %v106_v37 }
  0x80   :  { %v61_v32 = vpop.f32.mrf.mxu0 }
  0x81   :  { %v62_v33 = vadd.f32 %v195_v31, %v61_v32 }
  0x83   :  { %v64_v34 = vmax.f32 %v62_v33, 0.0 }
  0x85   :  { %101 = vmatmul.f32.vlgmr.msra.gmra.mxu1 %v64_v34 }
  0x98   :  { %v168_v46 = vpop.f32.mrf.mxu3 }
 0x102   :  { %v102_v40 = vpop.f32.mrf.mxu1 }
 0x103   :  { %v103_v41 = vadd.f32 %v196_v39, %v102_v40 }
 0x105   :  { %v105_v42 = vmax.f32 %v103_v41, 0.0 }
 0x107   :  { %142 = vmatmul.f32.vlgmr.msra.gmra.mxu2 %v105_v42 }
 0x18a   :  { %v143_v44 = vpop.f32.mrf.mxu2 }
 0x18b   :  { %v144_v45 = vadd.f32 %v197_v43, %v143_v44 }
 0x18d   :  { %198 = vtanh.f32 %v144_v45 }
 0x193   :  { %v199_v47 = vpop.eup %198 }
 0x194   :  { %v171_v48 = vadd.f32 %v199_v47, %v168_v46 }
 0x196   :  { %173 = vst.msk [vmem:[#allocation2] sm:$0xff] %vm172_vm2, %v171_v48 }
 0x197   :  { %184 = dma.vmem_to_hbm [thread:$0]  %s180_s27, 128, %s182_s30, [#allocation3]  }
 0x198   :  { %224 = dma.done.wait [#allocation3], 128  }
 0x199   :  { %225 = vsyncadd [#allocation3], 4294967168 }
 0x19a   :  { %189 = vsyncpa [#allocation3], 1 }

</bundles_post_ra>
